<compile_context>
chip_gen: v6e
topology: v6e:2x2x1
jax: 0.10.0
libtpu: 0.0.40
codegen_flags: <defaults>
</compile_context>

<pallas_src>
import math

import jax
import jax.numpy as jnp
from jax.experimental import pallas as pl
from jax.experimental.pallas import tpu as pltpu  # noqa: F401  (kept for TPU-specific tuning hooks)

# ---- model hyper-parameters (small, consistent with the module's config) ----
BATCH = 2
SEQ = 8          # num_tokens == block_size (context_length)
D_MODEL = 32
N_HEAD = 4
HEAD_DIM = D_MODEL // N_HEAD
D_FF = 4 * D_MODEL
LN_EPS = 1e-5    # torch.nn.LayerNorm default
NEG_INF = -1e30  # large finite negative: no NaN even for fully-masked rows


def _layernorm(x, gamma, beta):
    mean = jnp.mean(x, axis=-1, keepdims=True)
    var = jnp.mean((x - mean) ** 2, axis=-1, keepdims=True)   # biased var, like torch LN
    return (x - mean) * jax.lax.rsqrt(var + LN_EPS) * gamma + beta


def _new_gelu(x):
    return 0.5 * x * (1.0 + jnp.tanh(math.sqrt(2.0 / math.pi) * (x + 0.044715 * x * x * x)))


def block_kernel(x_ref, mask_ref,
                 ln1_g_ref, ln1_b_ref,
                 wqkv_ref, wo_ref, bo_ref,
                 ln2_g_ref, ln2_b_ref,
                 w1_ref, b1_ref, w2_ref, b2_ref,
                 o_ref):
    x = x_ref[...]                                              # (B*T, D)
    bt = x.shape[0]

    # ---------------- attention branch ----------------
    h = _layernorm(x, ln1_g_ref[...], ln1_b_ref[...])           # (BT, D)

    # Fused, head-batched QKV: (3H, BT, D) x (3H, D, Hd) -> (3H, BT, Hd).
    # Heads live on the leading/batch axis -> only leading-dim slices below, no lane slicing.
    hb = jnp.broadcast_to(h[None], (3 * N_HEAD, bt, D_MODEL))
    qkv = jnp.einsum('znd,zdk->znk', hb, wqkv_ref[...],
                     preferred_element_type=jnp.float32)        # (3H, BT, Hd)
    q = qkv[:N_HEAD]                                            # (H, BT, Hd)
    k = qkv[N_HEAD:2 * N_HEAD]
    v = qkv[2 * N_HEAD:]

    # Scores; 1/sqrt(head_dim) is already folded into the query weights.
    s = jnp.einsum('hqk,hsk->hqs', q, k,
                   preferred_element_type=jnp.float32)          # (H, BT, BT)
    s = s + mask_ref[...]                                       # block-diag causal additive mask
    s = s - jnp.max(s, axis=-1, keepdims=True)
    p = jnp.exp(s)
    p = p * pl.reciprocal(jnp.sum(p, axis=-1, keepdims=True), approx=True)
    # TODO(synk): attention-weight dropout (p=0.1) omitted -> eval-mode semantics.

    ctx = jnp.einsum('hqs,hsk->hqk', p, v,
                     preferred_element_type=jnp.float32)        # (H, BT, Hd)
    # Fold the head-concat into the output projection: per-head matmul, then sum over heads.
    proj = jnp.einsum('hqk,hkd->hqd', ctx, wo_ref[...],
                      preferred_element_type=jnp.float32)       # (H, BT, D)
    x1 = x + jnp.sum(proj, axis=0) + bo_ref[...]                # residual + out-proj bias

    # ---------------- MLP branch ----------------
    h2 = _layernorm(x1, ln2_g_ref[...], ln2_b_ref[...])
    ff = jnp.dot(h2, w1_ref[...], preferred_element_type=jnp.float32) + b1_ref[...]
    ff = _new_gelu(ff)
    mlp = jnp.dot(ff, w2_ref[...], preferred_element_type=jnp.float32) + b2_ref[...]

    o_ref[...] = (x1 + mlp).astype(o_ref.dtype)


def block_forward(x, params):
    B, T, D = x.shape
    BT = B * T
    (ln1_g, ln1_b, wq, wk, wv, wo, bo, ln2_g, ln2_b, w1, b1, w2, b2) = params

    # ---- param prep (fused/head-major weights; scale folded into W_q) ----
    def headify(w):  # (D, D) -> (H, D, Hd), head-major on the output columns
        return w.reshape(D, N_HEAD, HEAD_DIM).transpose(1, 0, 2)

    wq_scaled = wq * (1.0 / math.sqrt(HEAD_DIM))
    wqkv_h = jnp.concatenate([headify(wq_scaled), headify(wk), headify(wv)], axis=0)  # (3H, D, Hd)
    wo_h = wo.reshape(N_HEAD, HEAD_DIM, D)                                            # (H, Hd, D)

    # Block-diagonal causal additive mask over the flattened (B*T) token axis.
    idx = jnp.arange(BT)
    same_batch = (idx[:, None] // T) == (idx[None, :] // T)
    causal = idx[None, :] <= idx[:, None]
    mask_bias = jnp.where(same_batch & causal, 0.0, NEG_INF).astype(jnp.float32)      # (BT, BT)

    # Flatten batch into rows (free, wrapper-side reshape) -> one grid-less kernel invocation.
    x2d = x.reshape(BT, D)
    out2d = pl.pallas_call(
        block_kernel,
        out_shape=jax.ShapeDtypeStruct((BT, D), x.dtype),
    )(x2d, mask_bias, ln1_g, ln1_b, wqkv_h, wo_h, bo, ln2_g, ln2_b, w1, b1, w2, b2)
    return out2d.reshape(B, T, D)


# ---------------- pure-JAX reference (for correctness check) ----------------
def block_reference(x, params):
    (ln1_g, ln1_b, wq, wk, wv, wo, bo, ln2_g, ln2_b, w1, b1, w2, b2) = params
    B, T, D = x.shape

    def ln(z, g, b):
        m = jnp.mean(z, axis=-1, keepdims=True)
        v = jnp.mean((z - m) ** 2, axis=-1, keepdims=True)
        return (z - m) / jnp.sqrt(v + LN_EPS) * g + b

    h = ln(x, ln1_g, ln1_b)
    q = (h @ wq).reshape(B, T, N_HEAD, HEAD_DIM).transpose(0, 2, 1, 3)
    k = (h @ wk).reshape(B, T, N_HEAD, HEAD_DIM).transpose(0, 2, 1, 3)
    v = (h @ wv).reshape(B, T, N_HEAD, HEAD_DIM).transpose(0, 2, 1, 3)
    s = jnp.einsum("bhqd,bhkd->bhqk", q, k) / math.sqrt(HEAD_DIM)
    mask = jnp.triu(jnp.ones((T, T), dtype=bool), k=1)
    s = jnp.where(mask[None, None], -jnp.inf, s)
    p = jax.nn.softmax(s, axis=-1)
    ctx = jnp.einsum("bhqk,bhkd->bhqd", p, v).transpose(0, 2, 1, 3).reshape(B, T, D)
    x1 = x + (ctx @ wo + bo)
    h2 = ln(x1, ln2_g, ln2_b)
    ff = h2 @ w1 + b1
    ff = 0.5 * ff * (1.0 + jnp.tanh(math.sqrt(2.0 / math.pi) * (ff + 0.044715 * ff ** 3)))
    return x1 + (ff @ w2 + b2)


def init_params(key):
    ks = jax.random.split(key, 8)
    scale = 0.02
    ln1_g = jnp.ones((1, D_MODEL), jnp.float32)
    ln1_b = jnp.zeros((1, D_MODEL), jnp.float32)
    wq = scale * jax.random.normal(ks[0], (D_MODEL, D_MODEL), jnp.float32)
    wk = scale * jax.random.normal(ks[1], (D_MODEL, D_MODEL), jnp.float32)
    wv = scale * jax.random.normal(ks[2], (D_MODEL, D_MODEL), jnp.float32)
    wo = scale * jax.random.normal(ks[3], (D_MODEL, D_MODEL), jnp.float32)
    bo = scale * jax.random.normal(ks[4], (1, D_MODEL), jnp.float32)
    ln2_g = jnp.ones((1, D_MODEL), jnp.float32)
    ln2_b = jnp.zeros((1, D_MODEL), jnp.float32)
    w1 = scale * jax.random.normal(ks[5], (D_MODEL, D_FF), jnp.float32)
    b1 = scale * jax.random.normal(ks[6], (1, D_FF), jnp.float32)
    w2 = scale * jax.random.normal(ks[7], (D_FF, D_MODEL), jnp.float32)
    b2 = jnp.zeros((1, D_MODEL), jnp.float32)
    return (ln1_g, ln1_b, wq, wk, wv, wo, bo, ln2_g, ln2_b, w1, b1, w2, b2)


if __name__ == "__main__":
    key = jax.random.PRNGKey(0)
    kx, kp = jax.random.split(key)
    x = jax.random.normal(kx, (BATCH, SEQ, D_MODEL), jnp.float32)
    params = init_params(kp)

    fwd = jax.jit(block_forward)
    out = jax.block_until_ready(fwd(x, params))

    ref = block_reference(x, params)
    assert out.shape == (BATCH, SEQ, D_MODEL)
    max_err = float(jnp.max(jnp.abs(out - ref)))
    assert jnp.allclose(out, ref, atol=2e-4, rtol=2e-3), f"mismatch vs reference (max abs err {max_err})"

    print("KERNEL_OK")
</pallas_src>

<mosaic_0001>
module attributes {stable_mosaic.version = 11 : i64} {
  func.func @block_kernel(%arg0: memref<16x32xf32, #tpu.memory_space<vmem>>, %arg1: memref<16x16xf32, #tpu.memory_space<vmem>>, %arg2: memref<1x32xf32, #tpu.memory_space<vmem>>, %arg3: memref<1x32xf32, #tpu.memory_space<vmem>>, %arg4: memref<12x32x8xf32, #tpu.memory_space<vmem>>, %arg5: memref<4x8x32xf32, #tpu.memory_space<vmem>>, %arg6: memref<1x32xf32, #tpu.memory_space<vmem>>, %arg7: memref<1x32xf32, #tpu.memory_space<vmem>>, %arg8: memref<1x32xf32, #tpu.memory_space<vmem>>, %arg9: memref<32x128xf32, #tpu.memory_space<vmem>>, %arg10: memref<1x128xf32, #tpu.memory_space<vmem>>, %arg11: memref<128x32xf32, #tpu.memory_space<vmem>>, %arg12: memref<1x32xf32, #tpu.memory_space<vmem>>, %arg13: memref<16x32xf32, #tpu.memory_space<vmem>>) attributes {dimension_semantics = [], scalar_prefetch = 0 : i64, scratch_operands = 0 : i64, tpu.core_type = #tpu.core_type<tc>} {
    %c0 = arith.constant 0 : index
    %c0_0 = arith.constant 0 : index
    %0 = vector.load %arg0[%c0, %c0_0] : memref<16x32xf32, #tpu.memory_space<vmem>>, vector<16x32xf32>
    %c0_1 = arith.constant 0 : index
    %c0_2 = arith.constant 0 : index
    %1 = vector.load %arg2[%c0_1, %c0_2] : memref<1x32xf32, #tpu.memory_space<vmem>>, vector<1x32xf32>
    %c0_3 = arith.constant 0 : index
    %c0_4 = arith.constant 0 : index
    %2 = vector.load %arg3[%c0_3, %c0_4] : memref<1x32xf32, #tpu.memory_space<vmem>>, vector<1x32xf32>
    %cst = arith.constant dense<0.000000e+00> : vector<16xf32>
    %3 = vector.multi_reduction <add>, %0, %cst [1] : vector<16x32xf32> to vector<16xf32>
    %4 = vector.shape_cast %3 : vector<16xf32> to vector<16x1xf32>
    %cst_5 = arith.constant 3.200000e+01 : f32
    %5 = vector.broadcast %cst_5 : f32 to vector<16x1xf32>
    %6 = arith.divf %4, %5 : vector<16x1xf32>
    %7 = vector.broadcast %6 : vector<16x1xf32> to vector<16x32xf32>
    %8 = arith.subf %0, %7 : vector<16x32xf32>
    %9 = arith.mulf %8, %8 : vector<16x32xf32>
    %cst_6 = arith.constant dense<0.000000e+00> : vector<16xf32>
    %10 = vector.multi_reduction <add>, %9, %cst_6 [1] : vector<16x32xf32> to vector<16xf32>
    %11 = vector.shape_cast %10 : vector<16xf32> to vector<16x1xf32>
    %cst_7 = arith.constant 3.200000e+01 : f32
    %12 = vector.broadcast %cst_7 : f32 to vector<16x1xf32>
    %13 = arith.divf %11, %12 : vector<16x1xf32>
    %14 = vector.broadcast %6 : vector<16x1xf32> to vector<16x32xf32>
    %15 = arith.subf %0, %14 : vector<16x32xf32>
    %cst_8 = arith.constant 9.99999974E-6 : f32
    %16 = vector.broadcast %cst_8 : f32 to vector<16x1xf32>
    %17 = arith.addf %13, %16 : vector<16x1xf32>
    %18 = math.rsqrt %17 : vector<16x1xf32>
    %19 = vector.broadcast %18 : vector<16x1xf32> to vector<16x32xf32>
    %20 = arith.mulf %15, %19 : vector<16x32xf32>
    %21 = vector.broadcast %1 : vector<1x32xf32> to vector<16x32xf32>
    %22 = arith.mulf %20, %21 : vector<16x32xf32>
    %23 = vector.broadcast %2 : vector<1x32xf32> to vector<16x32xf32>
    %24 = arith.addf %22, %23 : vector<16x32xf32>
    %25 = vector.shape_cast %24 : vector<16x32xf32> to vector<1x16x32xf32>
    %26 = vector.shape_cast %25 : vector<1x16x32xf32> to vector<1x16x32xf32>
    %27 = vector.broadcast %26 : vector<1x16x32xf32> to vector<12x16x32xf32>
    %c0_9 = arith.constant 0 : index
    %c0_10 = arith.constant 0 : index
    %c0_11 = arith.constant 0 : index
    %28 = vector.load %arg4[%c0_9, %c0_10, %c0_11] : memref<12x32x8xf32, #tpu.memory_space<vmem>>, vector<12x32x8xf32>
    "tpu.trace_start"() <{level = 10 : i32, message = "znd,zdk->znk"}> : () -> ()
    %cst_12 = arith.constant dense<0.000000e+00> : vector<12x16x8xf32>
    %29 = tpu.matmul %27, %28, %cst_12 {dimension_numbers = #tpu.dot_dimension_numbers<[2], [1], [1], [2], [0, 0, 0, 1, 1, 2], [0], [0]>} : vector<12x16x32xf32>, vector<12x32x8xf32>, vector<12x16x8xf32> -> vector<12x16x8xf32>
    "tpu.trace_stop"() : () -> ()
    %30 = vector.extract_strided_slice %29 {offsets = [0, 0, 0], sizes = [4, 16, 8], strides = [1, 1, 1]} : vector<12x16x8xf32> to vector<4x16x8xf32>
    %31 = vector.extract_strided_slice %29 {offsets = [4, 0, 0], sizes = [4, 16, 8], strides = [1, 1, 1]} : vector<12x16x8xf32> to vector<4x16x8xf32>
    %32 = vector.extract_strided_slice %29 {offsets = [8, 0, 0], sizes = [4, 16, 8], strides = [1, 1, 1]} : vector<12x16x8xf32> to vector<4x16x8xf32>
    "tpu.trace_start"() <{level = 10 : i32, message = "hqk,hsk->hqs"}> : () -> ()
    %cst_13 = arith.constant dense<0.000000e+00> : vector<4x16x16xf32>
    %33 = tpu.matmul %30, %31, %cst_13 {dimension_numbers = #tpu.dot_dimension_numbers<[2], [2], [1], [1], [0, 0, 0, 1, 1, 1], [0], [0]>} : vector<4x16x8xf32>, vector<4x16x8xf32>, vector<4x16x16xf32> -> vector<4x16x16xf32>
    "tpu.trace_stop"() : () -> ()
    %c0_14 = arith.constant 0 : index
    %c0_15 = arith.constant 0 : index
    %34 = vector.load %arg1[%c0_14, %c0_15] : memref<16x16xf32, #tpu.memory_space<vmem>>, vector<16x16xf32>
    %35 = vector.shape_cast %34 : vector<16x16xf32> to vector<1x16x16xf32>
    %36 = vector.broadcast %35 : vector<1x16x16xf32> to vector<4x16x16xf32>
    %37 = arith.addf %33, %36 : vector<4x16x16xf32>
    %cst_16 = arith.constant dense<0xFF800000> : vector<4x16xf32>
    %38 = vector.multi_reduction <maximumf>, %37, %cst_16 [2] : vector<4x16x16xf32> to vector<4x16xf32>
    %39 = vector.shape_cast %38 : vector<4x16xf32> to vector<4x16x1xf32>
    %40 = vector.broadcast %39 : vector<4x16x1xf32> to vector<4x16x16xf32>
    %41 = arith.subf %37, %40 : vector<4x16x16xf32>
    %42 = math.exp %41 : vector<4x16x16xf32>
    %cst_17 = arith.constant dense<0.000000e+00> : vector<4x16xf32>
    %43 = vector.multi_reduction <add>, %42, %cst_17 [2] : vector<4x16x16xf32> to vector<4x16xf32>
    %44 = vector.shape_cast %43 : vector<4x16xf32> to vector<4x16x1xf32>
    %45 = tpu.reciprocal %44 {approx = true} : vector<4x16x1xf32> -> vector<4x16x1xf32>
    %46 = vector.broadcast %45 : vector<4x16x1xf32> to vector<4x16x16xf32>
    %47 = arith.mulf %42, %46 : vector<4x16x16xf32>
    "tpu.trace_start"() <{level = 10 : i32, message = "hqs,hsk->hqk"}> : () -> ()
    %cst_18 = arith.constant dense<0.000000e+00> : vector<4x16x8xf32>
    %48 = tpu.matmul %47, %32, %cst_18 {dimension_numbers = #tpu.dot_dimension_numbers<[2], [1], [1], [2], [0, 0, 0, 1, 1, 2], [0], [0]>} : vector<4x16x16xf32>, vector<4x16x8xf32>, vector<4x16x8xf32> -> vector<4x16x8xf32>
    "tpu.trace_stop"() : () -> ()
    %c0_19 = arith.constant 0 : index
    %c0_20 = arith.constant 0 : index
    %c0_21 = arith.constant 0 : index
    %49 = vector.load %arg5[%c0_19, %c0_20, %c0_21] : memref<4x8x32xf32, #tpu.memory_space<vmem>>, vector<4x8x32xf32>
    "tpu.trace_start"() <{level = 10 : i32, message = "hqk,hkd->hqd"}> : () -> ()
    %cst_22 = arith.constant dense<0.000000e+00> : vector<4x16x32xf32>
    %50 = tpu.matmul %48, %49, %cst_22 {dimension_numbers = #tpu.dot_dimension_numbers<[2], [1], [1], [2], [0, 0, 0, 1, 1, 2], [0], [0]>} : vector<4x16x8xf32>, vector<4x8x32xf32>, vector<4x16x32xf32> -> vector<4x16x32xf32>
    "tpu.trace_stop"() : () -> ()
    %cst_23 = arith.constant dense<0.000000e+00> : vector<16x32xf32>
    %51 = vector.multi_reduction <add>, %50, %cst_23 [0] : vector<4x16x32xf32> to vector<16x32xf32>
    %52 = arith.addf %0, %51 : vector<16x32xf32>
    %c0_24 = arith.constant 0 : index
    %c0_25 = arith.constant 0 : index
    %53 = vector.load %arg6[%c0_24, %c0_25] : memref<1x32xf32, #tpu.memory_space<vmem>>, vector<1x32xf32>
    %54 = vector.broadcast %53 : vector<1x32xf32> to vector<16x32xf32>
    %55 = arith.addf %52, %54 : vector<16x32xf32>
    %c0_26 = arith.constant 0 : index
    %c0_27 = arith.constant 0 : index
    %56 = vector.load %arg7[%c0_26, %c0_27] : memref<1x32xf32, #tpu.memory_space<vmem>>, vector<1x32xf32>
    %c0_28 = arith.constant 0 : index
    %c0_29 = arith.constant 0 : index
    %57 = vector.load %arg8[%c0_28, %c0_29] : memref<1x32xf32, #tpu.memory_space<vmem>>, vector<1x32xf32>
    %cst_30 = arith.constant dense<0.000000e+00> : vector<16xf32>
    %58 = vector.multi_reduction <add>, %55, %cst_30 [1] : vector<16x32xf32> to vector<16xf32>
    %59 = vector.shape_cast %58 : vector<16xf32> to vector<16x1xf32>
    %cst_31 = arith.constant 3.200000e+01 : f32
    %60 = vector.broadcast %cst_31 : f32 to vector<16x1xf32>
    %61 = arith.divf %59, %60 : vector<16x1xf32>
    %62 = vector.broadcast %61 : vector<16x1xf32> to vector<16x32xf32>
    %63 = arith.subf %55, %62 : vector<16x32xf32>
    %64 = arith.mulf %63, %63 : vector<16x32xf32>
    %cst_32 = arith.constant dense<0.000000e+00> : vector<16xf32>
    %65 = vector.multi_reduction <add>, %64, %cst_32 [1] : vector<16x32xf32> to vector<16xf32>
    %66 = vector.shape_cast %65 : vector<16xf32> to vector<16x1xf32>
    %cst_33 = arith.constant 3.200000e+01 : f32
    %67 = vector.broadcast %cst_33 : f32 to vector<16x1xf32>
    %68 = arith.divf %66, %67 : vector<16x1xf32>
    %69 = vector.broadcast %61 : vector<16x1xf32> to vector<16x32xf32>
    %70 = arith.subf %55, %69 : vector<16x32xf32>
    %cst_34 = arith.constant 9.99999974E-6 : f32
    %71 = vector.broadcast %cst_34 : f32 to vector<16x1xf32>
    %72 = arith.addf %68, %71 : vector<16x1xf32>
    %73 = math.rsqrt %72 : vector<16x1xf32>
    %74 = vector.broadcast %73 : vector<16x1xf32> to vector<16x32xf32>
    %75 = arith.mulf %70, %74 : vector<16x32xf32>
    %76 = vector.broadcast %56 : vector<1x32xf32> to vector<16x32xf32>
    %77 = arith.mulf %75, %76 : vector<16x32xf32>
    %78 = vector.broadcast %57 : vector<1x32xf32> to vector<16x32xf32>
    %79 = arith.addf %77, %78 : vector<16x32xf32>
    %c0_35 = arith.constant 0 : index
    %c0_36 = arith.constant 0 : index
    %80 = vector.load %arg9[%c0_35, %c0_36] : memref<32x128xf32, #tpu.memory_space<vmem>>, vector<32x128xf32>
    %cst_37 = arith.constant dense<0.000000e+00> : vector<16x128xf32>
    %81 = tpu.matmul %79, %80, %cst_37 {dimension_numbers = #tpu.dot_dimension_numbers<[1], [0], [0], [1], [0, 0, 1, 1], [], []>} : vector<16x32xf32>, vector<32x128xf32>, vector<16x128xf32> -> vector<16x128xf32>
    %c0_38 = arith.constant 0 : index
    %c0_39 = arith.constant 0 : index
    %82 = vector.load %arg10[%c0_38, %c0_39] : memref<1x128xf32, #tpu.memory_space<vmem>>, vector<1x128xf32>
    %83 = vector.broadcast %82 : vector<1x128xf32> to vector<16x128xf32>
    %84 = arith.addf %81, %83 : vector<16x128xf32>
    %cst_40 = arith.constant 5.000000e-01 : f32
    %85 = vector.broadcast %cst_40 : f32 to vector<16x128xf32>
    %86 = arith.mulf %85, %84 : vector<16x128xf32>
    %cst_41 = arith.constant 4.471500e-02 : f32
    %87 = vector.broadcast %cst_41 : f32 to vector<16x128xf32>
    %88 = arith.mulf %87, %84 : vector<16x128xf32>
    %89 = arith.mulf %88, %84 : vector<16x128xf32>
    %90 = arith.mulf %89, %84 : vector<16x128xf32>
    %91 = arith.addf %84, %90 : vector<16x128xf32>
    %cst_42 = arith.constant 0.797884583 : f32
    %92 = vector.broadcast %cst_42 : f32 to vector<16x128xf32>
    %93 = arith.mulf %92, %91 : vector<16x128xf32>
    %94 = math.tanh %93 : vector<16x128xf32>
    %cst_43 = arith.constant 1.000000e+00 : f32
    %95 = vector.broadcast %cst_43 : f32 to vector<16x128xf32>
    %96 = arith.addf %95, %94 : vector<16x128xf32>
    %97 = arith.mulf %86, %96 : vector<16x128xf32>
    %c0_44 = arith.constant 0 : index
    %c0_45 = arith.constant 0 : index
    %98 = vector.load %arg11[%c0_44, %c0_45] : memref<128x32xf32, #tpu.memory_space<vmem>>, vector<128x32xf32>
    %cst_46 = arith.constant dense<0.000000e+00> : vector<16x32xf32>
    %99 = tpu.matmul %97, %98, %cst_46 {dimension_numbers = #tpu.dot_dimension_numbers<[1], [0], [0], [1], [0, 0, 1, 1], [], []>} : vector<16x128xf32>, vector<128x32xf32>, vector<16x32xf32> -> vector<16x32xf32>
    %c0_47 = arith.constant 0 : index
    %c0_48 = arith.constant 0 : index
    %100 = vector.load %arg12[%c0_47, %c0_48] : memref<1x32xf32, #tpu.memory_space<vmem>>, vector<1x32xf32>
    %101 = vector.broadcast %100 : vector<1x32xf32> to vector<16x32xf32>
    %102 = arith.addf %99, %101 : vector<16x32xf32>
    %103 = arith.addf %55, %102 : vector<16x32xf32>
    %c0_49 = arith.constant 0 : index
    %c0_50 = arith.constant 0 : index
    %104 = vector.load %arg13[%c0_49, %c0_50] : memref<16x32xf32, #tpu.memory_space<vmem>>, vector<16x32xf32>
    tpu.vector_store %arg13[%c0_49, %c0_50], %103 {strides = array<i32>} : memref<16x32xf32, #tpu.memory_space<vmem>>, vector<16x32xf32>,
    return
  }
}

</mosaic_0001>

<bundles_post_ra>
// kernel: block_forward.1
= control target key start
LH: loop header
LB: loop body
LE: loop exit
PB: predicated region body
PF: predicated region fallthrough
CT: control target
= control target key end

     0   :  { %vm49_vm0 = vcmask 261120   ;;  %s3453_s0 = inlined_call_operand.vmem [shape: f32[16,32], index: 0, kind: input, shape index: {}]   ;;  %s3454_s1 = inlined_call_operand.vmem [shape: f32[16,16], index: 1, kind: input, shape index: {}]   ;;  %s3455_s2 = inlined_call_operand.vmem [shape: f32[1,32], index: 2, kind: input, shape index: {}]   ;;  %s3456_s3 = inlined_call_operand.vmem [shape: f32[1,32], index: 3, kind: input, shape index: {}]   ;;  %s3457_s4 = inlined_call_operand.vmem [shape: f32[12,32,8], index: 4, kind: input, shape index: {}]   ;;  %s3458_s5 = inlined_call_operand.vmem [shape: f32[4,8,32], index: 5, kind: input, shape index: {}]   ;;  %s3459_s6 = inlined_call_operand.vmem [shape: f32[1,32], index: 6, kind: input, shape index: {}]   ;;  %s3460_s7 = inlined_call_operand.vmem [shape: f32[1,32], index: 7, kind: input, shape index: {}]   ;;  %s3461_s8 = inlined_call_operand.vmem [shape: f32[1,32], index: 8, kind: input, shape index: {}]   ;;  %s3462_s9 = inlined_call_operand.vmem [shape: f32[32,128], index: 9, kind: input, shape index: {}]   ;;  %s3463_s10 = inlined_call_operand.vmem [shape: f32[1,128], index: 10, kind: input, shape index: {}]   ;;  %s3464_s11 = inlined_call_operand.vmem [shape: f32[128,32], index: 11, kind: input, shape index: {}]   ;;  %s3465_s12 = inlined_call_operand.vmem [shape: f32[1,32], index: 12, kind: input, shape index: {}]   ;;  %s3466_s13 = inlined_call_operand.hbm [shape: f32[16,32], index: 13, kind: output, shape index: {}]  }
   0x1   :  { %v3040_v0 = vld [vmem:[%s3453_s0] sm:$0xff]  ;;  %v3045_v1 = vld [vmem:[%s3453_s0 + $0x8] sm:$0xff] }
   0x2   :  { %18 = vsyncpa [#allocation3], 0  ;;  %v50_v2 = vsel %vm49_vm0, %v3040_v0, 0.0  ;;  %v53_v3 = vsel %vm49_vm0, %v3045_v1, 0.0  ;;  %v96_v14 = vld [vmem:[%s3457_s4 + $0x18] sm:$0xff]  ;;  %v95_v16 = vld [vmem:[%s3457_s4 + $0x10] sm:$0xff] }
   0x3   :  { %51 = vadd.xlane.f32.xlu0 %v50_v2  ;;  %v108_v15 = vld [vmem:[%s3457_s4 + $0x78] sm:$0xff]  ;;  %2641 = vmatprep.subr.mxu0 %v96_v14  ;;  %v107_v17 = vld [vmem:[%s3457_s4 + $0x70] sm:$0xff]  ;;  %v94_v18 = vld [vmem:[%s3457_s4 + $0x8] sm:$0xff]  ;;  %vm1049_vm1 = vcmask 64512   ;;  %vm1398_vm2 = vcmask 130048  }
   0x4   :  { %2674 = vmatprep.subr.mxu1 %v108_v15  ;;  %2642 = vmatpush3.msra.mxu0 %v96_v14  ;;  %v106_v19 = vld [vmem:[%s3457_s4 + $0x68] sm:$0xff]  ;;  %v93_v20 = vld [vmem:[%s3457_s4] sm:$0xff]  ;;  %v100_v22 = vld [vmem:[%s3457_s4 + $0x38] sm:$0xff] }
   0x5   :  { %2675 = vmatpush3.msra.mxu1 %v108_v15  ;;  %2643 = vmatprep.subr.mxu0 %v95_v16  ;;  %v105_v21 = vld [vmem:[%s3457_s4 + $0x60] sm:$0xff]  ;;  %v116_v23 = vld [vmem:[%s3457_s4 + $0xb8] sm:$0xff]  ;;  %v99_v40 = vld [vmem:[%s3457_s4 + $0x30] sm:$0xff] }
   0x6   :  { %2676 = vmatprep.subr.mxu1 %v107_v17  ;;  %2644 = vmatpush3.msra.mxu0 %v95_v16  ;;  %v2436_v31 = vld [vmem:[%s3455_s2] ss:$0 sm:$0xff]  ;;  %v115_v41 = vld [vmem:[%s3457_s4 + $0xb0] sm:$0xff]  ;;  %v98_v42 = vld [vmem:[%s3457_s4 + $0x28] sm:$0xff]  ;;  %s2964_s2 = smov [#allocation2]  }
   0x7   :  { %54 = vadd.xlane.f32.xlu0 %v53_v3  ;;  %2677 = vmatpush3.msra.mxu1 %v107_v17  ;;  %v2437_v33 = vld [vmem:[%s3456_s3] ss:$0 sm:$0xff]  ;;  %v114_v43 = vld [vmem:[%s3457_s4 + $0xa8] sm:$0xff]  ;;  %v104_v46 = vld [vmem:[%s3457_s4 + $0x58] sm:$0xff]  ;;  %s2425_s17 = sshll.u32 %s2964_s2, 4  ;;  %s2426_s17 = int_to_ptr.vmem [resolvable:$true] %s2425_s17 }
   0x8   :  { %2645 = vmatprep.subr.mxu0 %v94_v18  ;;  %2678 = vmatprep.subr.mxu1 %v106_v19  ;;  %v97_v44 = vld [vmem:[%s3457_s4 + $0x20] sm:$0xff]  ;;  %v124_v47 = vld [vmem:[%s3457_s4 + $0xf8] sm:$0xff]  ;;  %v103_v48 = vld [vmem:[%s3457_s4 + $0x50] sm:$0xff]  ;;  %s2942_s3 = scalar_lea.vmem %s2426_s17, 256  ;;  %p2947_p1 = scmp.lt.s32.totalorder %s2426_s17, %s2426_s17 }
   0x9   :  { %2646 = vmatpush3.msra.mxu0 %v94_v18  ;;  %2679 = vmatpush3.msra.mxu1 %v106_v19  ;;  %v113_v45 = vld [vmem:[%s3457_s4 + $0xa0] sm:$0xff]  ;;  %v123_v49 = vld [vmem:[%s3457_s4 + $0xf0] sm:$0xff]  ;;  %v102_v50 = vld [vmem:[%s3457_s4 + $0x48] sm:$0xff]  ;;  %p2943_p0 = scmp.ne.s32.totalorder %s2426_s17, %s2942_s3  ;;  %p2948_p2 = scmp.lt.s32.totalorder %s2942_s3, %s2942_s3 }
   0xa   :  { %2647 = vmatprep.subr.mxu0 %v93_v20  ;;  %2680 = vmatprep.subr.mxu1 %v105_v21  ;;  %v122_v51 = vld [vmem:[%s3457_s4 + $0xe8] sm:$0xff]  ;;  %v101_v52 = vld [vmem:[%s3457_s4 + $0x40] sm:$0xff]  ;;  %v112_v54 = vld [vmem:[%s3457_s4 + $0x98] sm:$0xff] }
   0xb   :  { %2648 = vmatpush3.msra.mxu0 %v93_v20  ;;  %2681 = vmatpush3.msra.mxu1 %v105_v21  ;;  %v121_v53 = vld [vmem:[%s3457_s4 + $0xe0] sm:$0xff]  ;;  %v132_v55 = vld [vmem:[%s3457_s4 + $0x138] sm:$0xff]  ;;  %v111_v56 = vld [vmem:[%s3457_s4 + $0x90] sm:$0xff]  ;;  %p2949_p3 = por %p2948_p2, %p2947_p1 }
   0xc   :  { %2652 = vmatprep.subr.mxu0 %v100_v22  ;;  %2696 = vmatprep.subr.mxu1 %v116_v23  ;;  %v131_v57 = vld [vmem:[%s3457_s4 + $0x130] sm:$0xff]  ;;  %v110_v58 = vld [vmem:[%s3457_s4 + $0x88] sm:$0xff]  ;;  %v109_v60 = vld [vmem:[%s3457_s4 + $0x80] sm:$0xff] }
   0xd   :  { %v130_v59 = vld [vmem:[%s3457_s4 + $0x128] sm:$0xff]  ;;  %v129_v61 = vld [vmem:[%s3457_s4 + $0x120] sm:$0xff]  ;;  %v120_v62 = vld [vmem:[%s3457_s4 + $0xd8] sm:$0xff]  ;;  %p2950_p4 = pnand %p2949_p3, %p2943_p0 }
   0xe   :  { %v140_v63 = vld [vmem:[%s3457_s4 + $0x178] sm:$0xff]  ;;  %v119_v2 = vld [vmem:[%s3457_s4 + $0xd0] sm:$0xff]  ;;  %v134_v14 = vld [vmem:[%s3457_s4 + $0x148] sm:$0xff] }
   0xf   :  { %v139_v3 = vld [vmem:[%s3457_s4 + $0x170] sm:$0xff]  ;;  %v133_v15 = vld [vmem:[%s3457_s4 + $0x140] sm:$0xff] }
  0x8c   :  { %v52_v4 = vpop.xlane.xlu0 %51 }
  0x8d   :  { %v57_v5 = vmul.f32 0.03125, %v52_v4  ;;  %v118_v4 = vld [vmem:[%s3457_s4 + $0xc8] sm:$0xff] }
  0x8f   :  { %v59_v6 = vsub.f32 %v3040_v0, %v57_v5  ;;  %v138_v5 = vld [vmem:[%s3457_s4 + $0x168] sm:$0xff] }
  0x90   :  { %v55_v7 = vpop.xlane.xlu0 %54 }
  0x91   :  { %v58_v8 = vmul.f32 0.03125, %v55_v7  ;;  %v61_v9 = vmul.f32 %v59_v6, %v59_v6  ;;  %v137_v7 = vld [vmem:[%s3457_s4 + $0x160] sm:$0xff] }
  0x93   :  { %v60_v10 = vsub.f32 %v3045_v1, %v58_v8  ;;  %v63_v11 = vsel %vm49_vm0, %v61_v9, 0.0  ;;  %v128_v8 = vld [vmem:[%s3457_s4 + $0x118] sm:$0xff]  ;;  %v127_v9 = vld [vmem:[%s3457_s4 + $0x110] sm:$0xff] }
  0x94   :  { %64 = vadd.xlane.f32.xlu1 %v63_v11  ;;  %v125_v11 = vld [vmem:[%s3457_s4 + $0x100] sm:$0xff] }
  0x95   :  { %v62_v12 = vmul.f32 %v60_v10, %v60_v10 }
  0x97   :  { %v66_v13 = vsel %vm49_vm0, %v62_v12, 0.0  ;;  %v136_v12 = vld [vmem:[%s3457_s4 + $0x158] sm:$0xff] }
  0x98   :  { %67 = vadd.xlane.f32.xlu1 %v66_v13  ;;  %v135_v13 = vld [vmem:[%s3457_s4 + $0x150] sm:$0xff] }
 0x11d   :  { %v65_v24 = vpop.xlane.xlu1 %64 }
 0x11e   :  { %v69_v25 = vmul.f32 0.03125, %v65_v24 }
 0x120   :  { %v71_v26 = vadd.f32 1e-05, %v69_v25 }
 0x121   :  { %v68_v27 = vpop.xlane.xlu1 %67 }
 0x122   :  { %2898 = vrsqrt.f32 %v71_v26  ;;  %v70_v28 = vmul.f32 0.03125, %v68_v27 }
 0x124   :  { %v72_v29 = vadd.f32 1e-05, %v70_v28 }
 0x126   :  { %2900 = vrsqrt.f32 %v72_v29 }
 0x12f   :  { %v2899_v30 = vpop.eup %2898 }
 0x130   :  { %v75_v32 = vmul.f32 %v2899_v30, %v59_v6  ;;  %v117_v6 = vld [vmem:[%s3457_s4 + $0xc0] sm:$0xff] }
 0x132   :  { %v83_v34 = vmul.f32 %v2436_v31, %v75_v32 }
 0x133   :  { %v2901_v35 = vpop.eup %2900 }
 0x134   :  { %v3091_v36 = vadd.f32 %v2437_v33, %v83_v34  ;;  %v76_v37 = vmul.f32 %v2901_v35, %v60_v10  ;;  %v126_v10 = vld [vmem:[%s3457_s4 + $0x108] sm:$0xff] }
 0x136   :  { %v84_v38 = vmul.f32 %v2436_v31, %v76_v37  ;;  %2649 = vmatprep.mubr.msk.f32.mxu0 %vm49_vm0, %v3091_v36  ;;  %2682 = vmatprep.mubr.msk.f32.mxu1 %vm49_vm0, %v3091_v36 }
 0x138   :  { %v3097_v39 = vadd.f32 %v2437_v33, %v84_v38 }
 0x13a   :  { %2650 = vmatmul.mubr.msk.f32.vlgmr.msra.gmra.mxu0 %vm49_vm0, %v3097_v39  ;;  %2683 = vmatmul.mubr.msk.f32.vlgmr.msra.gmra.mxu1 %vm49_vm0, %v3097_v39 }
 0x13b   :  { %2653 = vmatpush3.msra.mxu0 %v100_v22  ;;  %2697 = vmatpush3.msra.mxu1 %v116_v23 }
 0x13c   :  { %2654 = vmatprep.subr.mxu0 %v99_v40  ;;  %2660 = vmatprep.mubr.msk.f32.mxu0 %vm49_vm0, %v3091_v36 }
 0x13d   :  { %2698 = vmatprep.subr.mxu1 %v115_v41  ;;  %2704 = vmatprep.mubr.msk.f32.mxu1 %vm49_vm0, %v3091_v36 }
 0x13e   :  { %2655 = vmatpush3.msra.mxu0 %v99_v40  ;;  %2699 = vmatpush3.msra.mxu1 %v115_v41  ;;  %v1048_v41 = vld [vmem:[%s3454_s1 + $0x8] sm:$0xff] }
 0x13f   :  { %2656 = vmatprep.subr.mxu0 %v98_v42  ;;  %2700 = vmatprep.subr.mxu1 %v114_v43 }
 0x140   :  { %2657 = vmatpush3.msra.mxu0 %v98_v42  ;;  %2701 = vmatpush3.msra.mxu1 %v114_v43 }
 0x141   :  { %2658 = vmatprep.subr.mxu0 %v97_v44  ;;  %2702 = vmatprep.subr.mxu1 %v113_v45 }
 0x142   :  { %2659 = vmatpush3.msra.mxu0 %v97_v44  ;;  %2703 = vmatpush3.msra.mxu1 %v113_v45  ;;  %v1047_v44 = vld [vmem:[%s3454_s1] sm:$0xff] }
 0x143   :  { %2661 = vmatmul.mubr.msk.f32.vlgmr.msra.gmra.mxu0 %vm49_vm0, %v3097_v39  ;;  %2663 = vmatprep.subr.mxu0 %v104_v46 }
 0x144   :  { %2705 = vmatmul.mubr.msk.f32.vlgmr.msra.gmra.mxu1 %vm49_vm0, %v3097_v39  ;;  %2718 = vmatprep.subr.mxu1 %v124_v47 }
 0x145   :  { %2664 = vmatpush3.msra.mxu0 %v104_v46  ;;  %2671 = vmatprep.mubr.msk.f32.mxu0 %vm49_vm0, %v3091_v36 }
 0x146   :  { %2719 = vmatpush3.msra.mxu1 %v124_v47  ;;  %2726 = vmatprep.mubr.msk.f32.mxu1 %vm49_vm0, %v3091_v36 }
 0x147   :  { %2665 = vmatprep.subr.mxu0 %v103_v48  ;;  %2720 = vmatprep.subr.mxu1 %v123_v49 }
 0x148   :  { %2666 = vmatpush3.msra.mxu0 %v103_v48  ;;  %2721 = vmatpush3.msra.mxu1 %v123_v49 }
 0x149   :  { %2667 = vmatprep.subr.mxu0 %v102_v50  ;;  %2722 = vmatprep.subr.mxu1 %v122_v51 }
 0x14a   :  { %2668 = vmatpush3.msra.mxu0 %v102_v50  ;;  %2723 = vmatpush3.msra.mxu1 %v122_v51 }
 0x14b   :  { %2669 = vmatprep.subr.mxu0 %v101_v52  ;;  %2724 = vmatprep.subr.mxu1 %v121_v53 }
 0x14c   :  { %2670 = vmatpush3.msra.mxu0 %v101_v52  ;;  %2725 = vmatpush3.msra.mxu1 %v121_v53 }
 0x14d   :  { %2672 = vmatmul.mubr.msk.f32.vlgmr.msra.gmra.mxu0 %vm49_vm0, %v3097_v39  ;;  %2685 = vmatprep.subr.mxu0 %v112_v54 }
 0x14e   :  { %2727 = vmatmul.mubr.msk.f32.vlgmr.msra.gmra.mxu1 %vm49_vm0, %v3097_v39  ;;  %2740 = vmatprep.subr.mxu1 %v132_v55 }
 0x14f   :  { %2686 = vmatpush3.msra.mxu0 %v112_v54  ;;  %2693 = vmatprep.mubr.msk.f32.mxu0 %vm49_vm0, %v3091_v36 }
 0x150   :  { %2741 = vmatpush3.msra.mxu1 %v132_v55  ;;  %2748 = vmatprep.mubr.msk.f32.mxu1 %vm49_vm0, %v3091_v36 }
 0x151   :  { %2687 = vmatprep.subr.mxu0 %v111_v56  ;;  %2742 = vmatprep.subr.mxu1 %v131_v57 }
 0x152   :  { %2688 = vmatpush3.msra.mxu0 %v111_v56  ;;  %2743 = vmatpush3.msra.mxu1 %v131_v57 }
 0x153   :  { %2689 = vmatprep.subr.mxu0 %v110_v58  ;;  %2744 = vmatprep.subr.mxu1 %v130_v59 }
 0x154   :  { %2690 = vmatpush3.msra.mxu0 %v110_v58  ;;  %2745 = vmatpush3.msra.mxu1 %v130_v59 }
 0x155   :  { %2691 = vmatprep.subr.mxu0 %v109_v60  ;;  %2746 = vmatprep.subr.mxu1 %v129_v61 }
 0x156   :  { %2692 = vmatpush3.msra.mxu0 %v109_v60  ;;  %2747 = vmatpush3.msra.mxu1 %v129_v61 }
 0x157   :  { %2694 = vmatmul.mubr.msk.f32.vlgmr.msra.gmra.mxu0 %vm49_vm0, %v3097_v39  ;;  %2707 = vmatprep.subr.mxu0 %v120_v62 }
 0x158   :  { %2749 = vmatmul.mubr.msk.f32.vlgmr.msra.gmra.mxu1 %vm49_vm0, %v3097_v39  ;;  %2762 = vmatprep.subr.mxu1 %v140_v63 }
 0x159   :  { %2708 = vmatpush3.msra.mxu0 %v120_v62  ;;  %2715 = vmatprep.mubr.msk.f32.mxu0 %vm49_vm0, %v3091_v36 }
 0x15a   :  { %2763 = vmatpush3.msra.mxu1 %v140_v63  ;;  %2770 = vmatprep.mubr.msk.f32.mxu1 %vm49_vm0, %v3091_v36 }
 0x15b   :  { %2709 = vmatprep.subr.mxu0 %v119_v2  ;;  %2764 = vmatprep.subr.mxu1 %v139_v3 }
 0x15c   :  { %2710 = vmatpush3.msra.mxu0 %v119_v2  ;;  %2765 = vmatpush3.msra.mxu1 %v139_v3 }
 0x15d   :  { %2711 = vmatprep.subr.mxu0 %v118_v4  ;;  %2766 = vmatprep.subr.mxu1 %v138_v5 }
 0x15e   :  { %2712 = vmatpush3.msra.mxu0 %v118_v4  ;;  %2767 = vmatpush3.msra.mxu1 %v138_v5 }
 0x15f   :  { %2713 = vmatprep.subr.mxu0 %v117_v6  ;;  %2768 = vmatprep.subr.mxu1 %v137_v7 }
 0x160   :  { %2714 = vmatpush3.msra.mxu0 %v117_v6  ;;  %2769 = vmatpush3.msra.mxu1 %v137_v7 }
 0x161   :  { %2716 = vmatmul.mubr.msk.f32.vlgmr.msra.gmra.mxu0 %vm49_vm0, %v3097_v39  ;;  %2729 = vmatprep.subr.mxu0 %v128_v8 }
 0x162   :  { %2771 = vmatmul.mubr.msk.f32.vlgmr.msra.gmra.mxu1 %vm49_vm0, %v3097_v39  ;;  %2730 = vmatpush3.msra.mxu0 %v128_v8 }
 0x163   :  { %2737 = vmatprep.mubr.msk.f32.mxu0 %vm49_vm0, %v3091_v36  ;;  %2731 = vmatprep.subr.mxu0 %v127_v9 }
 0x164   :  { %2732 = vmatpush3.msra.mxu0 %v127_v9 }
 0x165   :  { %2733 = vmatprep.subr.mxu0 %v126_v10 }
 0x166   :  { %2734 = vmatpush3.msra.mxu0 %v126_v10 }
 0x167   :  { %2735 = vmatprep.subr.mxu0 %v125_v11 }
 0x168   :  { %2736 = vmatpush3.msra.mxu0 %v125_v11 }
 0x169   :  { %2738 = vmatmul.mubr.msk.f32.vlgmr.msra.gmra.mxu0 %vm49_vm0, %v3097_v39  ;;  %2751 = vmatprep.subr.mxu0 %v136_v12 }
 0x16a   :  { %2752 = vmatpush3.msra.mxu0 %v136_v12  ;;  %2759 = vmatprep.mubr.msk.f32.mxu0 %vm49_vm0, %v3091_v36 }
 0x16b   :  { %2753 = vmatprep.subr.mxu0 %v135_v13 }
 0x16c   :  { %2754 = vmatpush3.msra.mxu0 %v135_v13 }
 0x16d   :  { %2755 = vmatprep.subr.mxu0 %v134_v14 }
 0x16e   :  { %2756 = vmatpush3.msra.mxu0 %v134_v14 }
 0x16f   :  { %2757 = vmatprep.subr.mxu0 %v133_v15 }
 0x170   :  { %2758 = vmatpush3.msra.mxu0 %v133_v15 }
 0x171   :  { %2760 = vmatmul.mubr.msk.f32.vlgmr.msra.gmra.mxu0 %vm49_vm0, %v3097_v39 }
 0x1fa   :  { %v2651_v16 = vpop.f32.mrf.mxu0  ;;  %v2684_v18 = vpop.f32.mrf.mxu1 }
 0x1fc   :  { %v213_v17 = vpop.f32.mrf.mxu0  ;;  %v438_v19 = vpop.f32.mrf.mxu1 }
 0x1fd   :  { %2777 = vmatprep.mubr.msk.f32.mxu0 %vm1049_vm1, %v213_v17 }
 0x203   :  { %v2662_v20 = vpop.f32.mrf.mxu0 }
 0x204   :  { %v2706_v21 = vpop.f32.mrf.mxu1 }
 0x205   :  { %2780 = vmatprep.subr.msk.mxu1 %vm1049_vm1, %v2706_v21  ;;  %v288_v22 = vpop.f32.mrf.mxu0 }
 0x206   :  { %v588_v23 = vpop.f32.mrf.mxu1  ;;  %2781 = vmatpush3.xpose.msk.msra.mxu1 %vm1049_vm1, %v2706_v21  ;;  %2784 = vmatprep.mubr.msk.f32.mxu1 %vm1049_vm1, %v288_v22 }
 0x207   :  { %2782 = vmatprep.subr.msk.mxu1 %vm1049_vm1, %v588_v23 }
 0x20a   :  { %2783 = vmatpush3.xpose.msk.msra.mxu1 %vm1049_vm1, %v588_v23 }
 0x20d   :  { %2785 = vmatmul.mubr.msk.f32.vlgmr.msra.gmra.mxu1 %vm1049_vm1, %v2662_v20  ;;  %v2673_v26 = vpop.f32.mrf.mxu0 }
 0x20e   :  { %v2728_v24 = vpop.f32.mrf.mxu1  ;;  %2798 = vmatprep.mubr.msk.f32.mxu1 %vm1049_vm1, %v438_v19 }
 0x20f   :  { %2794 = vmatprep.subr.msk.mxu1 %vm1049_vm1, %v2728_v24  ;;  %v363_v27 = vpop.f32.mrf.mxu0 }
 0x210   :  { %v738_v25 = vpop.f32.mrf.mxu1  ;;  %2795 = vmatpush3.xpose.msk.msra.mxu1 %vm1049_vm1, %v2728_v24 }
 0x211   :  { %2796 = vmatprep.subr.msk.mxu1 %vm1049_vm1, %v738_v25 }
 0x214   :  { %2797 = vmatpush3.xpose.msk.msra.mxu1 %vm1049_vm1, %v738_v25 }
 0x217   :  { %v2695_v28 = vpop.f32.mrf.mxu0  ;;  %2799 = vmatmul.mubr.msk.f32.vlgmr.msra.gmra.mxu1 %vm1049_vm1, %v2684_v18 }
 0x218   :  { %2773 = vmatprep.subr.msk.mxu0 %vm1049_vm1, %v2695_v28  ;;  %v3273_v30 = vpop.f32.mrf.mxu1 }
 0x219   :  { %v513_v29 = vpop.f32.mrf.mxu0  ;;  %2774 = vmatpush3.xpose.msk.msra.mxu0 %vm1049_vm1, %v2695_v28 }
 0x21a   :  { %2775 = vmatprep.subr.msk.mxu0 %vm1049_vm1, %v513_v29  ;;  %v3276_v31 = vpop.f32.mrf.mxu1 }
 0x21d   :  { %2776 = vmatpush3.xpose.msk.msra.mxu0 %vm1049_vm1, %v513_v29 }
 0x220   :  { %2778 = vmatmul.mubr.msk.f32.vlgmr.msra.gmra.mxu0 %vm1049_vm1, %v2651_v16 }
 0x221   :  { %v2717_v32 = vpop.f32.mrf.mxu0  ;;  %2791 = vmatprep.mubr.msk.f32.mxu0 %vm1049_vm1, %v363_v27 }
 0x222   :  { %v2772_v33 = vpop.f32.mrf.mxu1  ;;  %2787 = vmatprep.subr.msk.mxu0 %vm1049_vm1, %v2717_v32 }
 0x223   :  { %2822 = vmatprep.subr.mxu1 %v2772_v33  ;;  %v663_v34 = vpop.f32.mrf.mxu0  ;;  %2788 = vmatpush3.xpose.msk.msra.mxu0 %vm1049_vm1, %v2717_v32 }
 0x224   :  { %v1038_v35 = vpop.f32.mrf.mxu1  ;;  %2823 = vmatpush3.msra.mxu1 %v2772_v33  ;;  %2789 = vmatprep.subr.msk.mxu0 %vm1049_vm1, %v663_v34 }
 0x225   :  { %2824 = vmatprep.subr.mxu1 %v1038_v35 }
 0x226   :  { %2825 = vmatpush3.msra.mxu1 %v1038_v35 }
 0x227   :  { %2790 = vmatpush3.xpose.msk.msra.mxu0 %vm1049_vm1, %v663_v34 }
 0x229   :  { %v2739_v36 = vpop.f32.mrf.mxu0 }
 0x22a   :  { %2792 = vmatmul.mubr.msk.f32.vlgmr.msra.gmra.mxu0 %vm1049_vm1, %v2673_v26  ;;  %2801 = vmatprep.subr.mxu0 %v2739_v36 }
 0x22b   :  { %v813_v37 = vpop.f32.mrf.mxu0  ;;  %2802 = vmatpush3.msra.mxu0 %v2739_v36 }
 0x22c   :  { %2803 = vmatprep.subr.mxu0 %v813_v37 }
 0x22d   :  { %2804 = vmatpush3.msra.mxu0 %v813_v37 }
 0x22e   :  { %2808 = vmatprep.subr.mxu0 %v3273_v30 }
 0x231   :  { %v3286_v38 = vpop.f32.mrf.mxu0 }
 0x233   :  { %v3288_v39 = vpop.f32.mrf.mxu0 }
 0x2cd   :  { %v2786_v40 = vpop.f32.mrf.mxu1 }
 0x2ce   :  { %v1221_v47 = vadd.f32 %v2786_v40, %v1048_v41 }
 0x2cf   :  { %v1215_v45 = vpop.f32.mrf.mxu1 }
 0x2d0   :  { %v1216_v50 = vadd.f32 %v1215_v45, %v1047_v44  ;;  %v1408_v52 = vsel %vm1398_vm2, %v1221_v47, -inf }
 0x2d2   :  { %v1405_v54 = vsel %vm1398_vm2, %v1216_v50, -inf }
 0x2d7   :  { %v2800_v53 = vpop.f32.mrf.mxu1 }
 0x2d8   :  { %v1395_v59 = vadd.f32 %v2800_v53, %v1048_v41 }
 0x2d9   :  { %v1389_v57 = vpop.f32.mrf.mxu1 }
 0x2da   :  { %v1390_v62 = vadd.f32 %v1389_v57, %v1047_v44  ;;  %v1420_v2 = vsel %vm1398_vm2, %v1395_v59, -inf }
 0x2dc   :  { %v1417_v3 = vsel %vm1398_vm2, %v1390_v62, -inf }
 0x2e0   :  { %v2779_v42 = vpop.f32.mrf.mxu0 }
 0x2e1   :  { %v1134_v43 = vadd.f32 %v2779_v42, %v1048_v41 }
 0x2e2   :  { %v1128_v46 = vpop.f32.mrf.mxu0 }
 0x2e3   :  { %v1129_v48 = vadd.f32 %v1128_v46, %v1047_v44  ;;  %v1402_v49 = vsel %vm1398_vm2, %v1134_v43, -inf }
 0x2e4   :  { %1403 = vmax.xlane.f32.xlu1 %v1402_v49 }
 0x2e5   :  { %v1399_v51 = vsel %vm1398_vm2, %v1129_v48, -inf }
 0x2e6   :  { %1400 = vmax.xlane.f32.xlu0 %v1399_v51 }
 0x2e8   :  { %1409 = vmax.xlane.f32.xlu1 %v1408_v52 }
 0x2ea   :  { %v2793_v55 = vpop.f32.mrf.mxu0  ;;  %1406 = vmax.xlane.f32.xlu0 %v1405_v54 }
 0x2eb   :  { %v1308_v56 = vadd.f32 %v2793_v55, %v1048_v41 }
 0x2ec   :  { %v1302_v58 = vpop.f32.mrf.mxu0 }
 0x2ed   :  { %v1303_v60 = vadd.f32 %v1302_v58, %v1047_v44  ;;  %v1414_v61 = vsel %vm1398_vm2, %v1308_v56, -inf }
 0x2ee   :  { %1415 = vmax.xlane.f32.xlu1 %v1414_v61 }
 0x2ef   :  { %v1411_v63 = vsel %vm1398_vm2, %v1303_v60, -inf }
 0x2f0   :  { %1412 = vmax.xlane.f32.xlu0 %v1411_v63 }
 0x2f2   :  { %1421 = vmax.xlane.f32.xlu1 %v1420_v2 }
 0x2f4   :  { %1418 = vmax.xlane.f32.xlu0 %v1417_v3 }
 0x36d   :  { %v1404_v4 = vpop.xlane.xlu1 %1403 }
 0x36e   :  { %v1424_v5 = vsub.f32 %v1134_v43, %v1404_v4 }
 0x36f   :  { %v1401_v6 = vpop.xlane.xlu0 %1400 }
 0x370   :  { %v1433_v7 = vmul.f32 1.442695, %v1424_v5  ;;  %v1423_v8 = vsub.f32 %v1129_v48, %v1401_v6 }
 0x371   :  { %v1410_v9 = vpop.xlane.xlu1 %1409 }
 0x372   :  { %2902 = vpow2.f32 %v1433_v7  ;;  %v1431_v10 = vmul.f32 1.442695, %v1423_v8  ;;  %v1426_v11 = vsub.f32 %v1221_v47, %v1410_v9  ;;  %v1813_v8 = vld [vmem:[%s3458_s5 + $0x10] sm:$0xff]  ;;  %v1814_v9 = vld [vmem:[%s3458_s5 + $0x18] sm:$0xff] }
 0x373   :  { %v1407_v12 = vpop.xlane.xlu0 %1406 }
 0x374   :  { %2904 = vpow2.f32 %v1431_v10  ;;  %v1437_v13 = vmul.f32 1.442695, %v1426_v11  ;;  %v1425_v14 = vsub.f32 %v1216_v50, %v1407_v12 }
 0x376   :  { %2906 = vpow2.f32 %v1437_v13  ;;  %v1435_v15 = vmul.f32 1.442695, %v1425_v14 }
 0x377   :  { %v1416_v16 = vpop.xlane.xlu1 %1415 }
 0x378   :  { %2908 = vpow2.f32 %v1435_v15  ;;  %v1428_v17 = vsub.f32 %v1308_v56, %v1416_v16 }
 0x379   :  { %v1413_v18 = vpop.xlane.xlu0 %1412 }
 0x37a   :  { %v1441_v19 = vmul.f32 1.442695, %v1428_v17  ;;  %v1427_v20 = vsub.f32 %v1303_v60, %v1413_v18 }
 0x37b   :  { %v1422_v21 = vpop.xlane.xlu1 %1421 }
 0x37c   :  { %2910 = vpow2.f32 %v1441_v19  ;;  %v1439_v22 = vmul.f32 1.442695, %v1427_v20  ;;  %v1430_v23 = vsub.f32 %v1395_v59, %v1422_v21 }
 0x37d   :  { %v1419_v24 = vpop.xlane.xlu0 %1418 }
 0x37e   :  { %2912 = vpow2.f32 %v1439_v22  ;;  %v1445_v25 = vmul.f32 1.442695, %v1430_v23  ;;  %v1429_v26 = vsub.f32 %v1390_v62, %v1419_v24 }
 0x37f   :  { %v2903_v27 = vpop.eup %2902 }
 0x380   :  { %2914 = vpow2.f32 %v1445_v25  ;;  %v1443_v28 = vmul.f32 1.442695, %v1429_v26  ;;  %v1450_v29 = vsel %vm1398_vm2, %v2903_v27, 0.0 }
 0x381   :  { %v2905_v32 = vpop.eup %2904  ;;  %1451 = vadd.xlane.f32.xlu1 %v1450_v29 }
 0x382   :  { %2916 = vpow2.f32 %v1443_v28  ;;  %v1447_v33 = vsel %vm1398_vm2, %v2905_v32, 0.0 }
 0x383   :  { %v2907_v34 = vpop.eup %2906  ;;  %1448 = vadd.xlane.f32.xlu0 %v1447_v33 }
 0x384   :  { %v1456_v35 = vsel %vm1398_vm2, %v2907_v34, 0.0 }
 0x385   :  { %v2909_v36 = vpop.eup %2908  ;;  %1457 = vadd.xlane.f32.xlu1 %v1456_v35 }
 0x386   :  { %v1453_v37 = vsel %vm1398_vm2, %v2909_v36, 0.0 }
 0x387   :  { %1454 = vadd.xlane.f32.xlu0 %v1453_v37 }
 0x389   :  { %v2911_v40 = vpop.eup %2910 }
 0x38a   :  { %v1462_v41 = vsel %vm1398_vm2, %v2911_v40, 0.0 }
 0x38b   :  { %v2913_v42 = vpop.eup %2912  ;;  %1463 = vadd.xlane.f32.xlu1 %v1462_v41 }
 0x38c   :  { %v1459_v43 = vsel %vm1398_vm2, %v2913_v42, 0.0 }
 0x38d   :  { %v2915_v44 = vpop.eup %2914  ;;  %1460 = vadd.xlane.f32.xlu0 %v1459_v43  ;;  %v2494_v43 = vld [vmem:[%s3459_s6] ss:$0 sm:$0xff] }
 0x38e   :  { %v1468_v45 = vsel %vm1398_vm2, %v2915_v44, 0.0 }
 0x38f   :  { %v2917_v46 = vpop.eup %2916  ;;  %1469 = vadd.xlane.f32.xlu1 %v1468_v45 }
 0x390   :  { %v1465_v47 = vsel %vm1398_vm2, %v2917_v46, 0.0 }
 0x391   :  { %1466 = vadd.xlane.f32.xlu0 %v1465_v47 }
 0x40a   :  { %v1452_v48 = vpop.xlane.xlu1 %1451 }
 0x40b   :  { %2918 = vrcp.f32 %v1452_v48 }
 0x40c   :  { %v1449_v49 = vpop.xlane.xlu0 %1448 }
 0x40d   :  { %2920 = vrcp.f32 %v1449_v49 }
 0x40e   :  { %v1458_v50 = vpop.xlane.xlu1 %1457 }
 0x40f   :  { %2922 = vrcp.f32 %v1458_v50 }
 0x410   :  { %v1455_v51 = vpop.xlane.xlu0 %1454 }
 0x411   :  { %2924 = vrcp.f32 %v1455_v51 }
 0x414   :  { %v1464_v52 = vpop.xlane.xlu1 %1463 }
 0x415   :  { %2926 = vrcp.f32 %v1464_v52 }
 0x416   :  { %v1461_v53 = vpop.xlane.xlu0 %1460 }
 0x417   :  { %2928 = vrcp.f32 %v1461_v53 }
 0x418   :  { %v1470_v54 = vpop.xlane.xlu1 %1469  ;;  %v2919_v55 = vpop.eup %2918 }
 0x419   :  { %2930 = vrcp.f32 %v1470_v54  ;;  %v1480_v59 = vmul.f32 %v2919_v55, %v2903_v27 }
 0x41a   :  { %v2921_v56 = vpop.eup %2920  ;;  %v1467_v57 = vpop.xlane.xlu0 %1466 }
 0x41b   :  { %2932 = vrcp.f32 %v1467_v57  ;;  %v1479_v58 = vmul.f32 %v2921_v56, %v2905_v32 }
 0x41c   :  { %v2923_v60 = vpop.eup %2922 }
 0x41d   :  { %2805 = vmatprep.mubr.msk.f32.mxu0 %vm1398_vm2, %v1479_v58  ;;  %v1482_v63 = vmul.f32 %v2923_v60, %v2907_v34  ;;  %v2210_v60 = vld [vmem:[%s3462_s9 + $0x10] sm:$0xff] }
 0x41e   :  { %v2925_v61 = vpop.eup %2924  ;;  %2806 = vmatmul.mubr.msk.f32.vlgmr.msra.gmra.mxu0 %vm1398_vm2, %v1480_v59  ;;  %v2211_v59 = vld [vmem:[%s3462_s9 + $0x18] sm:$0xff] }
 0x41f   :  { %2809 = vmatpush3.msra.mxu0 %v3273_v30  ;;  %v1481_v62 = vmul.f32 %v2925_v61, %v2909_v36  ;;  %v2209_v61 = vld [vmem:[%s3462_s9 + $0x8] sm:$0xff] }
 0x420   :  { %2810 = vmatprep.subr.mxu0 %v3276_v31 }
 0x421   :  { %2811 = vmatpush3.msra.mxu0 %v3276_v31  ;;  %2812 = vmatprep.mubr.msk.f32.mxu0 %vm1398_vm2, %v1481_v62  ;;  %v2208_v62 = vld [vmem:[%s3462_s9] sm:$0xff] }
 0x422   :  { %2815 = vmatprep.subr.mxu0 %v3286_v38  ;;  %2813 = vmatmul.mubr.msk.f32.vlgmr.msra.gmra.mxu0 %vm1398_vm2, %v1482_v63  ;;  %v2927_v2 = vpop.eup %2926 }
 0x423   :  { %2816 = vmatpush3.msra.mxu0 %v3286_v38  ;;  %v1484_v4 = vmul.f32 %v2927_v2, %v2911_v40  ;;  %v1811_v38 = vld [vmem:[%s3458_s5] sm:$0xff] }
 0x424   :  { %v2929_v3 = vpop.eup %2928  ;;  %2817 = vmatprep.subr.mxu0 %v3288_v39 }
 0x425   :  { %2818 = vmatpush3.msra.mxu0 %v3288_v39  ;;  %v1483_v30 = vmul.f32 %v2929_v3, %v2913_v42  ;;  %v1812_v39 = vld [vmem:[%s3458_s5 + $0x8] sm:$0xff] }
 0x426   :  { %v2931_v5 = vpop.eup %2930  ;;  %2829 = vmatprep.subr.mxu0 %v1811_v38  ;;  %2834 = vmatprep.subr.mxu1 %v1812_v39 }
 0x427   :  { %2819 = vmatprep.mubr.msk.f32.mxu0 %vm1398_vm2, %v1483_v30  ;;  %v1486_v7 = vmul.f32 %v2931_v5, %v2915_v44 }
 0x428   :  { %v2933_v31 = vpop.eup %2932  ;;  %2820 = vmatmul.mubr.msk.f32.vlgmr.msra.gmra.mxu0 %vm1398_vm2, %v1484_v4 }
 0x429   :  { %v1485_v6 = vmul.f32 %v2933_v31, %v2917_v46  ;;  %2830 = vmatpush3.msra.mxu0 %v1811_v38 }
 0x42a   :  { %2839 = vmatprep.subr.mxu0 %v1813_v8 }
 0x42b   :  { %2826 = vmatprep.mubr.msk.f32.mxu1 %vm1398_vm2, %v1485_v6  ;;  %v2495_v6 = vld [vmem:[%s3460_s7] ss:$0 sm:$0xff] }
 0x42c   :  { %2827 = vmatmul.mubr.msk.f32.vlgmr.msra.gmra.mxu1 %vm1398_vm2, %v1486_v7 }
 0x42d   :  { %2835 = vmatpush3.msra.mxu1 %v1812_v39 }
 0x42e   :  { %2844 = vmatprep.subr.mxu1 %v1814_v9 }
 0x4de   :  { %v2807_v10 = vpop.f32.mrf.mxu0 }
 0x4e0   :  { %v1559_v11 = vpop.f32.mrf.mxu0 }
 0x4e1   :  { %2831 = vmatprep.mubr.msk.f32.mxu0 %vm1049_vm1, %v1559_v11 }
 0x4e2   :  { %v2814_v12 = vpop.f32.mrf.mxu0  ;;  %2832 = vmatmul.mubr.msk.f32.vlgmr.msra.gmra.mxu0 %vm1049_vm1, %v2807_v10 }
 0x4e3   :  { %2840 = vmatpush3.msra.mxu0 %v1813_v8 }
 0x4e4   :  { %v1640_v13 = vpop.f32.mrf.mxu0  ;;  %2849 = vmatprep.subr.mxu0 %v2211_v59 }
 0x4e5   :  { %2836 = vmatprep.mubr.msk.f32.mxu1 %vm1049_vm1, %v1640_v13  ;;  %v2333_v13 = vld [vmem:[%s3464_s11 + $0x78] sm:$0xff] }
 0x4e6   :  { %2837 = vmatmul.mubr.msk.f32.vlgmr.msra.gmra.mxu1 %vm1049_vm1, %v2814_v12 }
 0x4e7   :  { %2845 = vmatpush3.msra.mxu1 %v1814_v9  ;;  %v2496_v9 = vld [vmem:[%s3461_s8] ss:$0 sm:$0xff] }
 0x4e8   :  { %v2821_v14 = vpop.f32.mrf.mxu0  ;;  %2860 = vmatprep.subr.mxu1 %v2333_v13 }
 0x4ea   :  { %v1721_v15 = vpop.f32.mrf.mxu0 }
 0x4eb   :  { %2841 = vmatprep.mubr.msk.f32.mxu0 %vm1049_vm1, %v1721_v15  ;;  %v2331_v15 = vld [vmem:[%s3464_s11 + $0x68] sm:$0xff] }
 0x4ec   :  { %v2828_v16 = vpop.f32.mrf.mxu1  ;;  %2842 = vmatmul.mubr.msk.f32.vlgmr.msra.gmra.mxu0 %vm1049_vm1, %v2821_v14  ;;  %v2332_v14 = vld [vmem:[%s3464_s11 + $0x70] sm:$0xff] }
 0x4ed   :  { %2850 = vmatpush3.msra.mxu0 %v2211_v59 }
 0x4ee   :  { %v1802_v17 = vpop.f32.mrf.mxu1  ;;  %2851 = vmatprep.subr.mxu0 %v2210_v60 }
 0x4ef   :  { %2846 = vmatprep.mubr.msk.f32.mxu1 %vm1049_vm1, %v1802_v17  ;;  %2852 = vmatpush3.msra.mxu0 %v2210_v60  ;;  %v2329_v17 = vld [vmem:[%s3464_s11 + $0x58] sm:$0xff] }
 0x4f0   :  { %2847 = vmatmul.mubr.msk.f32.vlgmr.msra.gmra.mxu1 %vm1049_vm1, %v2828_v16  ;;  %2853 = vmatprep.subr.mxu0 %v2209_v61  ;;  %v2330_v16 = vld [vmem:[%s3464_s11 + $0x60] sm:$0xff] }
 0x4f1   :  { %2854 = vmatpush3.msra.mxu0 %v2209_v61  ;;  %2861 = vmatpush3.msra.mxu1 %v2333_v13 }
 0x4f2   :  { %2855 = vmatprep.subr.mxu0 %v2208_v62  ;;  %2862 = vmatprep.subr.mxu1 %v2332_v14 }
 0x4f3   :  { %2856 = vmatpush3.msra.mxu0 %v2208_v62  ;;  %2863 = vmatpush3.msra.mxu1 %v2332_v14 }
 0x4f4   :  { %2864 = vmatprep.subr.mxu1 %v2331_v15 }
 0x4f5   :  { %2865 = vmatpush3.msra.mxu1 %v2331_v15 }
 0x4f6   :  { %2866 = vmatprep.subr.mxu1 %v2330_v16 }
 0x4f7   :  { %2867 = vmatpush3.msra.mxu1 %v2330_v16 }
 0x4f8   :  { %2868 = vmatprep.subr.mxu1 %v2329_v17 }
 0x4f9   :  { %2869 = vmatpush3.msra.mxu1 %v2329_v17 }
 0x5a2   :  { %v2833_v18 = vpop.f32.mrf.mxu0 }
 0x5a3   :  { %v2146_v24 = vsel %vm49_vm0, %v2833_v18, 0.0  ;;  %v2328_v18 = vld [vmem:[%s3464_s11 + $0x50] sm:$0xff] }
 0x5a4   :  { %v1887_v20 = vpop.f32.mrf.mxu0  ;;  %2870 = vmatprep.subr.mxu1 %v2328_v18 }
 0x5a5   :  { %v2139_v29 = vsel %vm49_vm0, %v1887_v20, 0.0  ;;  %2871 = vmatpush3.msra.mxu1 %v2328_v18  ;;  %v2326_v20 = vld [vmem:[%s3464_s11 + $0x40] sm:$0xff] }
 0x5a6   :  { %v2838_v19 = vpop.f32.mrf.mxu1 }
 0x5a7   :  { %v2147_v22 = vsel %vm49_vm0, %v2838_v19, 0.0  ;;  %v2327_v19 = vld [vmem:[%s3464_s11 + $0x48] sm:$0xff] }
 0x5a8   :  { %v1968_v21 = vpop.f32.mrf.mxu1  ;;  %v2148_v27 = vadd.f32 %v2147_v22, %v2146_v24  ;;  %2872 = vmatprep.subr.mxu1 %v2327_v19  ;;  %v2324_v22 = vld [vmem:[%s3464_s11 + $0x30] sm:$0xff]  ;;  %v2322_v24 = vld [vmem:[%s3464_s11 + $0x20] sm:$0xff] }
 0x5a9   :  { %v2140_v25 = vsel %vm49_vm0, %v1968_v21, 0.0  ;;  %2873 = vmatpush3.msra.mxu1 %v2327_v19  ;;  %v2325_v21 = vld [vmem:[%s3464_s11 + $0x38] sm:$0xff] }
 0x5aa   :  { %v2141_v33 = vadd.f32 %v2140_v25, %v2139_v29  ;;  %2874 = vmatprep.subr.mxu1 %v2326_v20  ;;  %v2321_v25 = vld [vmem:[%s3464_s11 + $0x18] sm:$0xff]  ;;  %v2497_v29 = vld [vmem:[%s3463_s10] ss:$0 sm:$0xff] }
 0x5ab   :  { %2875 = vmatpush3.msra.mxu1 %v2326_v20 }
 0x5ac   :  { %v2843_v23 = vpop.f32.mrf.mxu0  ;;  %2876 = vmatprep.subr.mxu1 %v2325_v21 }
 0x5ad   :  { %v2149_v26 = vsel %vm49_vm0, %v2843_v23, 0.0  ;;  %2877 = vmatpush3.msra.mxu1 %v2325_v21  ;;  %v2323_v23 = vld [vmem:[%s3464_s11 + $0x28] sm:$0xff] }
 0x5ae   :  { %v2049_v28 = vpop.f32.mrf.mxu0  ;;  %v2150_v34 = vadd.f32 %v2149_v26, %v2148_v27  ;;  %2878 = vmatprep.subr.mxu1 %v2324_v22  ;;  %v2320_v26 = vld [vmem:[%s3464_s11 + $0x10] sm:$0xff]  ;;  %v2319_v27 = vld [vmem:[%s3464_s11 + $0x8] sm:$0xff] }
 0x5af   :  { %v2142_v32 = vsel %vm49_vm0, %v2049_v28, 0.0  ;;  %2879 = vmatpush3.msra.mxu1 %v2324_v22  ;;  %v2318_v28 = vld [vmem:[%s3464_s11] sm:$0xff] }
 0x5b0   :  { %v2848_v35 = vpop.f32.mrf.mxu1  ;;  %v2143_v37 = vadd.f32 %v2142_v32, %v2141_v33  ;;  %2880 = vmatprep.subr.mxu1 %v2323_v23 }
 0x5b1   :  { %v2151_v36 = vsel %vm49_vm0, %v2848_v35, 0.0  ;;  %2881 = vmatpush3.msra.mxu1 %v2323_v23 }
 0x5b2   :  { %v2152_v40 = vadd.f32 %v2151_v36, %v2150_v34  ;;  %v2130_v41 = vpop.f32.mrf.mxu1  ;;  %2882 = vmatprep.subr.mxu1 %v2322_v24 }
 0x5b3   :  { %v2144_v42 = vsel %vm49_vm0, %v2130_v41, 0.0  ;;  %2883 = vmatpush3.msra.mxu1 %v2322_v24 }
 0x5b4   :  { %v2154_v44 = vadd.f32 %v2152_v40, %v3045_v1  ;;  %v2145_v45 = vadd.f32 %v2144_v42, %v2143_v37  ;;  %2884 = vmatprep.subr.mxu1 %v2321_v25 }
 0x5b5   :  { %2885 = vmatpush3.msra.mxu1 %v2321_v25 }
 0x5b6   :  { %v2153_v46 = vadd.f32 %v2145_v45, %v3040_v0  ;;  %v3360_v47 = vadd.f32 %v2494_v43, %v2154_v44  ;;  %2886 = vmatprep.subr.mxu1 %v2320_v26 }
 0x5b7   :  { %2887 = vmatpush3.msra.mxu1 %v2320_v26 }
 0x5b8   :  { %v2169_v48 = vsel %vm49_vm0, %v3360_v47, 0.0  ;;  %v3364_v49 = vadd.f32 %v2494_v43, %v2153_v46  ;;  %2888 = vmatprep.subr.mxu1 %v2319_v27 }
 0x5b9   :  { %2170 = vadd.xlane.f32.xlu1 %v2169_v48  ;;  %2889 = vmatpush3.msra.mxu1 %v2319_v27 }
 0x5ba   :  { %v2166_v50 = vsel %vm49_vm0, %v3364_v49, 0.0  ;;  %2890 = vmatprep.subr.mxu1 %v2318_v28 }
 0x5bb   :  { %2167 = vadd.xlane.f32.xlu0 %v2166_v50  ;;  %2891 = vmatpush3.msra.mxu1 %v2318_v28 }
 0x642   :  { %v2171_v51 = vpop.xlane.xlu1 %2170 }
 0x643   :  { %v2173_v52 = vmul.f32 0.03125, %v2171_v51 }
 0x644   :  { %v2168_v53 = vpop.xlane.xlu0 %2167 }
 0x645   :  { %v2175_v1 = vsub.f32 %v3360_v47, %v2173_v52  ;;  %v2172_v54 = vmul.f32 0.03125, %v2168_v53 }
 0x647   :  { %v2174_v0 = vsub.f32 %v3364_v49, %v2172_v54  ;;  %v2177_v55 = vmul.f32 %v2175_v1, %v2175_v1 }
 0x649   :  { %v2181_v56 = vsel %vm49_vm0, %v2177_v55, 0.0  ;;  %v2176_v57 = vmul.f32 %v2174_v0, %v2174_v0 }
 0x64a   :  { %2182 = vadd.xlane.f32.xlu1 %v2181_v56  ;;  %v2500_v56 = vld [vmem:[%s3465_s12] ss:$0 sm:$0xff] }
 0x64b   :  { %v2178_v58 = vsel %vm49_vm0, %v2176_v57, 0.0 }
 0x64c   :  { %2179 = vadd.xlane.f32.xlu0 %v2178_v58 }
 0x6d3   :  { %v2183_v63 = vpop.xlane.xlu1 %2182 }
 0x6d4   :  { %v2185_v2 = vmul.f32 0.03125, %v2183_v63 }
 0x6d5   :  { %v2180_v3 = vpop.xlane.xlu0 %2179 }
 0x6d6   :  { %v2187_v30 = vadd.f32 1e-05, %v2185_v2  ;;  %v2184_v4 = vmul.f32 0.03125, %v2180_v3 }
 0x6d8   :  { %2934 = vrsqrt.f32 %v2187_v30  ;;  %v2186_v5 = vadd.f32 1e-05, %v2184_v4 }
 0x6da   :  { %2936 = vrsqrt.f32 %v2186_v5 }
 0x6e5   :  { %v2935_v31 = vpop.eup %2934 }
 0x6e6   :  { %v2191_v7 = vmul.f32 %v2935_v31, %v2175_v1 }
 0x6e7   :  { %v2937_v38 = vpop.eup %2936 }
 0x6e8   :  { %v2190_v39 = vmul.f32 %v2937_v38, %v2174_v0  ;;  %v2199_v8 = vmul.f32 %v2495_v6, %v2191_v7 }
 0x6ea   :  { %v2198_v10 = vmul.f32 %v2495_v6, %v2190_v39  ;;  %v2207_v12 = vadd.f32 %v2496_v9, %v2199_v8 }
 0x6ec   :  { %v2206_v11 = vadd.f32 %v2496_v9, %v2198_v10 }
 0x6ee   :  { %2857 = vmatprep.mubr.msk.f32.mxu0 %vm49_vm0, %v2206_v11 }
 0x6ef   :  { %2858 = vmatmul.mubr.msk.f32.vlgmr.msra.gmra.mxu0 %vm49_vm0, %v2207_v12 }
 0x7af   :  { %v2859_v32 = vpop.f32.mrf.mxu0 }
 0x7b0   :  { %v2297_v33 = vadd.f32 %v2859_v32, %v2497_v29 }
 0x7b1   :  { %v2291_v34 = vpop.f32.mrf.mxu0 }
 0x7b2   :  { %v2303_v35 = vmul.f32 0.044715, %v2297_v33  ;;  %v2292_v36 = vadd.f32 %v2497_v29, %v2291_v34  ;;  %v2301_v54 = vmul.f32 0.5, %v2297_v33 }
 0x7b4   :  { %v2305_v37 = vmul.f32 %v2303_v35, %v2297_v33  ;;  %v2302_v40 = vmul.f32 0.044715, %v2292_v36  ;;  %v2300_v53 = vmul.f32 0.5, %v2292_v36 }
 0x7b6   :  { %v2307_v41 = vmul.f32 %v2305_v37, %v2297_v33  ;;  %v2304_v42 = vmul.f32 %v2302_v40, %v2292_v36 }
 0x7b8   :  { %v2309_v43 = vadd.f32 %v2307_v41, %v2297_v33  ;;  %v2306_v44 = vmul.f32 %v2304_v42, %v2292_v36 }
 0x7ba   :  { %v2308_v45 = vadd.f32 %v2306_v44, %v2292_v36  ;;  %v2311_v46 = vmul.f32 0.7978846, %v2309_v43 }
 0x7bc   :  { %v2310_v48 = vmul.f32 0.7978846, %v2308_v45  ;;  %2938 = vtanh.f32 %v2311_v46 }
 0x7be   :  { %2940 = vtanh.f32 %v2310_v48 }
 0x7c9   :  { %v2939_v50 = vpop.eup %2938 }
 0x7ca   :  { %v2315_v52 = vadd.f32 1.0, %v2939_v50 }
 0x7cb   :  { %v2941_v51 = vpop.eup %2940 }
 0x7cc   :  { %v2314_v1 = vadd.f32 1.0, %v2941_v51  ;;  %v2317_v55 = vmul.f32 %v2315_v52, %v2301_v54 }
 0x7ce   :  { %v2316_v0 = vmul.f32 %v2314_v1, %v2300_v53 }
 0x7d0   :  { %2892 = vmatprep.mubr.f32.mxu1 %v2316_v0 }
 0x7d1   :  { %2893 = vmatmul.mubr.f32.vlgmr.msra.gmra.mxu1 %v2317_v55 }
 0x891   :  { %v2894_v57 = vpop.f32.mrf.mxu1 }
 0x892   :  { %v2413_v58 = vadd.f32 %v2894_v57, %v2500_v56 }
 0x893   :  { %v2407_v59 = vpop.f32.mrf.mxu1 }
 0x894   :  { %v2417_v60 = vadd.f32 %v2413_v58, %v3360_v47  ;;  %v2408_v61 = vadd.f32 %v2500_v56, %v2407_v59 }
 0x896   :  { %2419 = vst.msk [vmem:[#allocation2 + $0x8] sm:$0xff] %vm49_vm0, %v2417_v60  ;;  %v2416_v62 = vadd.f32 %v2408_v61, %v3364_v49 }
 0x898   :  { %2418 = vst.msk [vmem:[#allocation2] sm:$0xff] %vm49_vm0, %v2416_v62 }
 0x899   :  { %2953 = shalt.err (!%p2950_p4)
}
 0x89a   :  { %s2965_s12 = smov 128   ;;  %s2966_s18 = smov 8  }
 0x89b   :  { %2431 = dma.vmem_to_hbm [thread:$0]  %s2426_s17, 256, %s3466_s13, [#allocation3], %s2965_s12, %s2965_s12, %s2966_s18  }
 0x89c   :  { %2962 = dma.done.wait [#allocation3], 256  }
 0x89d   :  { %2963 = vsyncadd [#allocation3], 4294967040 }
 0x89e   :  { %2435 = vsyncpa [#allocation3], 1 }

</bundles_post_ra>
